<compile_context>
chip_gen: v6e
topology: v6e:2x2x1
jax: 0.10.0
libtpu: 0.0.40
codegen_flags: <defaults>
</compile_context>

<pallas_src>
import jax
import jax.numpy as jnp
from jax.experimental import pallas as pl
from jax.experimental.pallas import tpu as pltpu


def _conv1x1_kernel(x_ref, w_ref, b_ref, o_ref):
    # x_ref: (Nb, C_in, T)  lane-dense spatial tile of Nb batch elements
    # w_ref: (C_out, C_in)  full weight matrix, resident every grid step
    # b_ref: (C_out, 1)     bias column (broadcast over the lane/spatial dim)
    # o_ref: (Nb, C_out, T)
    nb, c_in, t = x_ref.shape
    c_out = o_ref.shape[1]

    b_f32 = b_ref[...].astype(jnp.float32)               # (C_out, 1)

    if c_in * c_out <= 64:
        # Tiny contraction (e.g. 4 -> 8 channels): unrolled broadcast-FMAs on
        # the VPU; kernel stays purely HBM-bound, no MXU push/pop latency.
        w_f32 = w_ref[...].astype(jnp.float32)            # (C_out, C_in)
        b_bcast = jnp.broadcast_to(b_f32, (c_out, t))     # hoisted, loop-invariant
        for i in range(nb):                               # static unroll, nb <= 8
            x = x_ref[i].astype(jnp.float32)              # (C_in, T)
            acc = b_bcast
            for k in range(c_in):
                acc = acc + w_f32[:, k:k + 1] * x[k:k + 1, :]
            o_ref[i] = acc.astype(o_ref.dtype)
    else:
        # Larger channel counts: MXU with native-dtype operands (bf16 stays
        # bf16 on v6e/v7x) and f32 accumulation via preferred_element_type.
        w = w_ref[...]
        for i in range(nb):                               # static unroll, nb <= 8
            acc = jnp.dot(w, x_ref[i], preferred_element_type=jnp.float32)
            o_ref[i] = (acc + b_f32).astype(o_ref.dtype)


def _vmem_tile_budget_bytes():
    """Per-generation budget for the double-buffered in/out tiles."""
    phys = 128 * 1024 * 1024                              # v5e/v6e physical VMEM
    try:
        info = pltpu.get_tpu_info()
        phys = int(getattr(info, "vmem_capacity_bytes", phys))
    except Exception:
        pass                                              # fall back to 128 MiB
    # ~5/8 of physical (=> ~40 MiB on v7x's 64 MiB), capped at 48 MiB.
    return int(min(phys * 5 // 8, 48 * 1024 * 1024))


_MAX_LANE_TILE = 32768   # lanes per step: large enough to amortize step overhead
_MAX_BATCH_FOLD = 8      # cap on the unrolled per-batch loop inside the kernel


def conv1x1_pallas(x_nchw, weight, bias):
    """1x1 conv (nn.Conv2d(in, out, 1)) on NCHW input via a Pallas kernel.

    x_nchw: (N, C_in, H, W)
    weight: (C_out, C_in, 1, 1)   -- PyTorch conv weight layout
    bias:   (C_out,)
    returns (N, C_out, H, W)
    """
    N, C_in, H, W = x_nchw.shape
    C_out = weight.shape[0]
    HW = H * W

    # NCHW stays put: view as (N, C_in, H*W). No transposes, no padding.
    x_v = x_nchw.reshape(N, C_in, HW)
    w_mat = weight.reshape(C_out, C_in)
    b_col = bias.reshape(C_out, 1)

    in_itm = jnp.dtype(x_nchw.dtype).itemsize
    out_itm = in_itm
    bytes_per_lane = C_in * in_itm + C_out * out_itm      # per batch elem per lane

    budget = _vmem_tile_budget_bytes()
    # Lane budget for one batch element per block, double-buffered in+out tiles.
    max_lanes = max(128, budget // (2 * bytes_per_lane))

    # --- spatial tiling ------------------------------------------------------
    if HW <= min(max_lanes, _MAX_LANE_TILE):
        t_hw = HW                      # full spatial extent: always layout-legal
        n_hw = 1
    else:
        t_hw = min(max_lanes, _MAX_LANE_TILE)
        t_hw = max(128, (t_hw // 128) * 128)   # lane-aligned tile
        n_hw = pl.cdiv(HW, t_hw)       # ragged last tile handled by Pallas masking

    # --- batch folding (small spatial) + megacore-friendly grid --------------
    if n_hw == 1 and N > 1:
        nb_cap = min(max(1, max_lanes // max(t_hw, 1)), _MAX_BATCH_FOLD)
        n_b = min(N, nb_cap)
        if pl.cdiv(N, n_b) * n_hw < 2:
            # Keep >= 2 grid steps so both TensorCores get work on v7x.
            n_b = min(max(1, pl.cdiv(N, 2)), nb_cap)
    else:
        n_b = 1

    if pl.cdiv(N, n_b) * n_hw < 2 and HW > 128:
        # N == 1 and one tile covers all of HW: split HW into two tiles.
        t_half = pl.cdiv(pl.cdiv(HW, 2), 128) * 128
        if t_half < HW:
            t_hw = t_half
            n_hw = pl.cdiv(HW, t_hw)

    grid = (pl.cdiv(N, n_b), n_hw)

    # --- VMEM limit: only set if tiles exceed the 32 MiB scoped default ------
    w_bytes = (C_out * C_in + C_out) * jnp.dtype(weight.dtype).itemsize
    tile_bytes = 2 * n_b * t_hw * bytes_per_lane + 2 * w_bytes
    needed = tile_bytes + (2 << 20)    # headroom for compiler scratch
    cp_kwargs = dict(dimension_semantics=("parallel", "parallel"))
    if needed > (32 << 20):
        cp_kwargs["vmem_limit_bytes"] = int(min(needed, budget + (8 << 20)))

    out = pl.pallas_call(
        _conv1x1_kernel,
        out_shape=jax.ShapeDtypeStruct((N, C_out, HW), x_nchw.dtype),
        grid_spec=pltpu.PrefetchScalarGridSpec(
            num_scalar_prefetch=0,
            grid=grid,
            in_specs=[
                pl.BlockSpec((n_b, C_in, t_hw), lambda n, j: (n, 0, j)),   # x tile
                pl.BlockSpec((C_out, C_in), lambda n, j: (0, 0)),          # weight
                pl.BlockSpec((C_out, 1), lambda n, j: (0, 0)),             # bias
            ],
            out_specs=pl.BlockSpec((n_b, C_out, t_hw), lambda n, j: (n, 0, j)),
        ),
        compiler_params=pltpu.CompilerParams(**cp_kwargs),
    )(x_v, w_mat, b_col)

    return out.reshape(N, C_out, H, W)


if __name__ == "__main__":
    # Small shapes consistent with the module: batch=2, in_channels=4,
    # out_channels=8, spatial=16x16.
    N, C_in, C_out, Hdim, Wdim = 2, 4, 8, 16, 16

    key = jax.random.PRNGKey(0)
    kx, kw, kb = jax.random.split(key, 3)

    x = jax.random.normal(kx, (N, C_in, Hdim, Wdim), dtype=jnp.float32)
    # Deterministic param init (synthetic; mirrors Conv2d(in, out, 1) param shapes)
    weight = jax.random.normal(kw, (C_out, C_in, 1, 1), dtype=jnp.float32) * 0.1
    bias = jax.random.normal(kb, (C_out,), dtype=jnp.float32) * 0.1

    y = conv1x1_pallas(x, weight, bias)
    y = jax.block_until_ready(y)

    # Reference check (pure JAX) to make sure semantics match a 1x1 conv.
    ref = jnp.einsum("nihw,oi->nohw", x, weight.reshape(C_out, C_in)) + bias[None, :, None, None]
    assert y.shape == (N, C_out, Hdim, Wdim)
    assert jnp.allclose(y, ref, atol=1e-5, rtol=1e-5)

    print("KERNEL_OK")
</pallas_src>

<mosaic_0001>
module attributes {stable_mosaic.version = 11 : i64} {
  func.func @_conv1x1_kernel(%arg0: i32, %arg1: i32, %arg2: memref<1x4x256xf32, #tpu.memory_space<vmem>>, %arg3: memref<8x4xf32, #tpu.memory_space<vmem>>, %arg4: memref<8x1xf32, #tpu.memory_space<vmem>>, %arg5: memref<1x8x256xf32, #tpu.memory_space<vmem>>) attributes {dimension_semantics = [#tpu.dimension_semantics<parallel>, #tpu.dimension_semantics<parallel>], iteration_bounds = array<i64: 2, 1>, scalar_prefetch = 0 : i64, scratch_operands = 0 : i64, tpu.core_type = #tpu.core_type<tc>, window_params = [{transform_indices = @transform_0, window_bounds = array<i64: 1, 4, 256>}, {pipeline_mode = #tpu.pipeline_mode<synchronous>, transform_indices = @transform_1, window_bounds = array<i64: 8, 4>}, {pipeline_mode = #tpu.pipeline_mode<synchronous>, transform_indices = @transform_2, window_bounds = array<i64: 8, 1>}, {transform_indices = @transform_3, window_bounds = array<i64: 1, 8, 256>}]} {
    %c0 = arith.constant 0 : index
    %c0_0 = arith.constant 0 : index
    %0 = vector.load %arg4[%c0, %c0_0] : memref<8x1xf32, #tpu.memory_space<vmem>>, vector<8x1xf32>
    %c0_1 = arith.constant 0 : index
    %c0_2 = arith.constant 0 : index
    %1 = vector.load %arg3[%c0_1, %c0_2] : memref<8x4xf32, #tpu.memory_space<vmem>>, vector<8x4xf32>
    %2 = vector.shape_cast %0 : vector<8x1xf32> to vector<8x1xf32>
    %3 = vector.broadcast %2 : vector<8x1xf32> to vector<8x256xf32>
    %c0_3 = arith.constant 0 : index
    %c0_4 = arith.constant 0 : index
    %c0_5 = arith.constant 0 : index
    %4 = vector.load %arg2[%c0_3, %c0_4, %c0_5] : memref<1x4x256xf32, #tpu.memory_space<vmem>>, vector<1x4x256xf32>
    %5 = vector.shape_cast %4 : vector<1x4x256xf32> to vector<4x256xf32>
    %6 = vector.extract_strided_slice %1 {offsets = [0, 0], sizes = [8, 1], strides = [1, 1]} : vector<8x4xf32> to vector<8x1xf32>
    %7 = vector.extract_strided_slice %5 {offsets = [0, 0], sizes = [1, 256], strides = [1, 1]} : vector<4x256xf32> to vector<1x256xf32>
    %8 = vector.broadcast %6 : vector<8x1xf32> to vector<8x256xf32>
    %9 = vector.broadcast %7 : vector<1x256xf32> to vector<8x256xf32>
    %10 = arith.mulf %8, %9 : vector<8x256xf32>
    %11 = arith.addf %3, %10 : vector<8x256xf32>
    %12 = vector.extract_strided_slice %1 {offsets = [0, 1], sizes = [8, 1], strides = [1, 1]} : vector<8x4xf32> to vector<8x1xf32>
    %13 = vector.extract_strided_slice %5 {offsets = [1, 0], sizes = [1, 256], strides = [1, 1]} : vector<4x256xf32> to vector<1x256xf32>
    %14 = vector.broadcast %12 : vector<8x1xf32> to vector<8x256xf32>
    %15 = vector.broadcast %13 : vector<1x256xf32> to vector<8x256xf32>
    %16 = arith.mulf %14, %15 : vector<8x256xf32>
    %17 = arith.addf %11, %16 : vector<8x256xf32>
    %18 = vector.extract_strided_slice %1 {offsets = [0, 2], sizes = [8, 1], strides = [1, 1]} : vector<8x4xf32> to vector<8x1xf32>
    %19 = vector.extract_strided_slice %5 {offsets = [2, 0], sizes = [1, 256], strides = [1, 1]} : vector<4x256xf32> to vector<1x256xf32>
    %20 = vector.broadcast %18 : vector<8x1xf32> to vector<8x256xf32>
    %21 = vector.broadcast %19 : vector<1x256xf32> to vector<8x256xf32>
    %22 = arith.mulf %20, %21 : vector<8x256xf32>
    %23 = arith.addf %17, %22 : vector<8x256xf32>
    %24 = vector.extract_strided_slice %1 {offsets = [0, 3], sizes = [8, 1], strides = [1, 1]} : vector<8x4xf32> to vector<8x1xf32>
    %25 = vector.extract_strided_slice %5 {offsets = [3, 0], sizes = [1, 256], strides = [1, 1]} : vector<4x256xf32> to vector<1x256xf32>
    %26 = vector.broadcast %24 : vector<8x1xf32> to vector<8x256xf32>
    %27 = vector.broadcast %25 : vector<1x256xf32> to vector<8x256xf32>
    %28 = arith.mulf %26, %27 : vector<8x256xf32>
    %29 = arith.addf %23, %28 : vector<8x256xf32>
    %c0_6 = arith.constant 0 : index
    %c0_7 = arith.constant 0 : index
    %c0_8 = arith.constant 0 : index
    %30 = vector.load %arg5[%c0_6, %c0_7, %c0_8] : memref<1x8x256xf32, #tpu.memory_space<vmem>>, vector<1x8x256xf32>
    %31 = vector.shape_cast %30 : vector<1x8x256xf32> to vector<8x256xf32>
    %32 = vector.shape_cast %29 : vector<8x256xf32> to vector<1x8x256xf32>
    tpu.vector_store %arg5[%c0_6, %c0_7, %c0_8], %32 {strides = array<i32>} : memref<1x8x256xf32, #tpu.memory_space<vmem>>, vector<1x8x256xf32>,
    return
  }
  func.func @transform_0(%arg0: i32, %arg1: i32) -> (i32, i32, i32) {
    %c0_i32 = arith.constant 0 : i32
    %c0_i32_0 = arith.constant 0 : i32
    return %arg0, %c0_i32, %arg1 : i32, i32, i32
  }
  func.func @transform_1(%arg0: i32, %arg1: i32) -> (i32, i32) {
    %c0_i32 = arith.constant 0 : i32
    %c0_i32_0 = arith.constant 0 : i32
    %c0_i32_1 = arith.constant 0 : i32
    return %c0_i32, %c0_i32_0 : i32, i32
  }
  func.func @transform_2(%arg0: i32, %arg1: i32) -> (i32, i32) {
    %c0_i32 = arith.constant 0 : i32
    %c0_i32_0 = arith.constant 0 : i32
    %c0_i32_1 = arith.constant 0 : i32
    return %c0_i32, %c0_i32_0 : i32, i32
  }
  func.func @transform_3(%arg0: i32, %arg1: i32) -> (i32, i32, i32) {
    %c0_i32 = arith.constant 0 : i32
    %c0_i32_0 = arith.constant 0 : i32
    return %arg0, %c0_i32, %arg1 : i32, i32, i32
  }
}

</mosaic_0001>

<bundles_post_ra>
// kernel: tpu_custom_call.1
= control target key start
LH: loop header
LB: loop body
LE: loop exit
PB: predicated region body
PF: predicated region fallthrough
CT: control target
= control target key end

     0   :  { %8 = vsyncpa [#allocation3], 0  ;;  %s705_s0 = inlined_call_operand.vmem [shape: f32[2,4,256], index: 0, kind: input, shape index: {}]   ;;  %s706_s1 = inlined_call_operand.vmem [shape: f32[8,4], index: 1, kind: input, shape index: {}]   ;;  %s707_s2 = inlined_call_operand.vmem [shape: f32[8,1], index: 2, kind: input, shape index: {}]   ;;  %s708_s3 = inlined_call_operand.hbm [shape: f32[2,8,256], index: 3, kind: output, shape index: {}]  }
   0x1   :  { %10 = vsyncpa [#allocation3 + $0x1], 0  ;;  %s590_s12 = smov 0   ;;  %s592_s13 = smov 0  }
   0x2   :  { %s594_s14 = smov 0   ;;  %s596_s15 = smov 0  }
   0x3   :  { %s598_s16 = smov 0   ;;  %s600_s17 = smov 0  }
   0x4 LB: > { %s409_s18 = sadd.s32 4294967295, %s563_s17   ;;  %s410_s19 = sadd.s32 4294967294, %s563_s17   ;;  %s563_s17 = sphi %s600_s17, %s16_s17   ;;  %s559_s16 = sphi %s598_s16, %s715_s16   ;;  %s555_s15 = sphi %s596_s15, %s714_s15   ;;  %s551_s14 = sphi %s594_s14, %s713_s14   ;;  %s547_s13 = sphi %s592_s13, %s712_s13   ;;  %s543_s12 = sphi %s590_s12, %s711_s12  }
   0x5   : > { %s28_s20 = sadd.s32 1, %s559_s16  ;;  %s107_s21 = sadd.s32 1, %s551_s14 }
   0x6   : > { %p30_p0 = scmp.ge.s32.totalorder %s28_s20, 2  ;;  %p117_p1 = scmp.ne.s32.totalorder %s551_s14, %s547_s13 }
   0x7   : > { %p118_p2 = scmp.eq.s32.totalorder %s409_s18, 1  ;;  %p123_p3 = scmp.ne.s32.totalorder %s547_s13, %s543_s12 }
   0x8   : > { %s717_s20 = smov (%p30_p0, %s28_s20), 0  ;;  %p124_p5 = scmp.eq.s32.totalorder %s410_s19, 1 }
   0x9   : > { %p630_p4 = por %p118_p2, %p117_p1  ;;  %s102_s23 = ssub.s32 %s559_s16, %s717_s20 }
   0xa   : > { %p413_p6 = scmp.ge.s32.totalorder %s563_s17, 1  ;;  %p105_p7 = scmp.eq.s32.totalorder %s102_s23, 0 }
   0xb   : > { %p637_p8 = por %p124_p5, %p123_p3  ;;  %p161_p9 = scmp.lt.s32.totalorder %s563_s17, 3 }
   0xc   : > { %s643_s25 = scalar_select %p105_p7, %s551_s14, %s107_s21  }
   0xd   : > { %p162_p10 = pnand %p413_p6, %p161_p9 }
   0xe   : > { %p190_p11 = scmp.lt.s32.totalorder (!%p162_p10), %s555_s15, 1  ;;  %s186_s8 = sand.u32 (!%p162_p10), 1, %s547_s13  }
   0xf   : > { %165 = sbr.rel (%p162_p10) target bundleno = 172 (0xac), region = 32  ;;  %s414_s9 = sshll.u32 (!%p162_p10), %s186_s8, 4 }
  0x10   : > { %s423_s10 = sshll.u32 (!%p162_p10), %s555_s15, 8  ;;  %s188_s11 = scalar_lea.vmem (!%p162_p10), [#allocation2], %s414_s9 }
  0x11   : > { %s333_s18 = sshll.u32 (!%p162_p10), %s188_s11, 4  ;;  %s663_s23 = scalar_lea.hbm (!%p162_p10), %s708_s3, %s423_s10  ;;  %s334_s18 = int_to_ptr.vmem [resolvable:$true] %s333_s18 }
  0x12   : > { %s317_s26 = scalar_lea.sflag (!%p162_p10), [#allocation3], %s186_s8  ;;  %s487_s27 = scalar_lea.vmem (!%p162_p10), %s334_s18, 256 }
  0x13   : > { %p488_p12 = scmp.ne.s32.totalorder (!%p162_p10), %s334_s18, %s487_s27 }
  0x14   : > { %v201_v0 = vld [vmem:[%s706_s1] sm:$0xff]  ;;  %v565_v1 = vmov 0   ;;  %v566_v2 = vmov 1   ;;  %v567_v4 = vmov 2   ;;  %v568_v5 = vmov 3   ;;  %s191_s30 = scalar_select %p190_p11, %s555_s15, 1 }
  0x15   : > { %483 = vset.pattern.permute.xlu0 %v565_v1  ;;  %484 = vset.pattern.permute.xlu1 %v566_v2  ;;  %v200_v3 = vld [vmem:[%s707_s2] sm:$0xff]  ;;  %v214_v6 = vlaneseq  ;;  %p489_p13 = pnand %p488_p12, %p630_p4  ;;  %s569_s15 = smov [#allocation2]  }
  0x16   : > { %210 = vperm.xlu0 %483, %v201_v0   ;;  %237 = vperm.xlu1 %484, %v201_v0   ;;  %s422_s4 = sshll.u32 %s191_s30, 3  ;;  %s491_s28 = sshll.u32 %s569_s15, 4  ;;  %s492_s28 = int_to_ptr.vmem [resolvable:$false] %s491_s28 }
  0x17   : > { %v215_v7 = vshrl.u32 %v214_v6, 7  ;;  %s197_s7 = scalar_lea.vmem %s705_s0, %s422_s4  ;;  %p490_p0 = pneg %p489_p13 }
  0x18   : > { %v207_v10 = vld [vmem:[%s197_s7] sm:$0xff]  ;;  %s493_s29 = scalar_lea.vmem %s492_s28, 512  ;;  %p494_p1 = scmp.lt.s32.totalorder %s334_s18, %s492_s28 }
  0x19   : > { %v216_v8 = vsub.s32 0, %v215_v7  ;;  %v220_v9 = vsub.s32 4, %v215_v7  ;;  %v242_v11 = vsub.s32 1, %v215_v7  ;;  %v246_v12 = vsub.s32 5, %v215_v7  ;;  %p495_p2 = scmp.lt.s32.totalorder %s493_s29, %s487_s27 }
  0x1a   : > { %204 = vperm.xlu0 %483, %v200_v3   ;;  %485 = vset.pattern.permute.xlu1 %v567_v4  ;;  %v268_v13 = vsub.s32 2, %v215_v7  ;;  %v272_v14 = vsub.s32 6, %v215_v7  ;;  %v294_v21 = vsub.s32 3, %v215_v7  ;;  %v298_v22 = vsub.s32 7, %v215_v7 }
  0x1b   : > { %263 = vperm.xlu1 %485, %v201_v0   ;;  %v217_v15 = vrot.slane %v207_v10, %v216_v8  ;;  %v221_v16 = vrot.slane %v207_v10, %v220_v9  ;;  %v243_v17 = vrot.slane %v207_v10, %v242_v11  ;;  %v247_v18 = vrot.slane %v207_v10, %v246_v12  ;;  %p496_p3 = por %p495_p2, %p494_p1 }
  0x1c   : > { %v269_v19 = vrot.slane %v207_v10, %v268_v13  ;;  %v273_v20 = vrot.slane %v207_v10, %v272_v14  ;;  %v295_v31 = vrot.slane %v207_v10, %v294_v21  ;;  %v299_v32 = vrot.slane %v207_v10, %v298_v22 }
  0x1d   : > { %v227_v23 = vrot.slane %v217_v15, %v216_v8  ;;  %v231_v24 = vrot.slane %v221_v16, %v216_v8  ;;  %v253_v27 = vrot.slane %v243_v17, %v242_v11  ;;  %v257_v28 = vrot.slane %v247_v18, %v242_v11  ;;  %p497_p5 = pnand %p496_p3, %p490_p0 }
  0x1e   : > { %486 = vset.pattern.permute.xlu0 %v568_v5  ;;  %v279_v29 = vrot.slane %v269_v19, %v268_v13  ;;  %v283_v30 = vrot.slane %v273_v20, %v268_v13  ;;  %v305_v43 = vrot.slane %v295_v31, %v294_v21  ;;  %v309_v44 = vrot.slane %v299_v32, %v294_v21 }
  0x1f   : > { %289 = vperm.xlu0 %486, %v201_v0  }
  0x91   : > { %v211_v25 = vpop.permute.xlu0 %210  ;;  %v238_v26 = vpop.permute.xlu1 %237 }
  0x92   : > { %v232_v33 = vmul.f32 %v227_v23, %v211_v25  ;;  %v233_v34 = vmul.f32 %v231_v24, %v211_v25  ;;  %v258_v36 = vmul.f32 %v253_v27, %v238_v26  ;;  %v259_v37 = vmul.f32 %v257_v28, %v238_v26 }
  0x95   : > { %v205_v35 = vpop.permute.xlu0 %204 }
  0x96   : > { %v234_v38 = vadd.f32 %v232_v33, %v205_v35  ;;  %v235_v39 = vadd.f32 %v233_v34, %v205_v35  ;;  %v264_v40 = vpop.permute.xlu1 %263 }
  0x97   : > { %v284_v41 = vmul.f32 %v279_v29, %v264_v40  ;;  %v285_v42 = vmul.f32 %v283_v30, %v264_v40 }
  0x98   : > { %v260_v45 = vadd.f32 %v258_v36, %v234_v38  ;;  %v261_v46 = vadd.f32 %v259_v37, %v235_v39 }
  0x9a   : > { %v286_v47 = vadd.f32 %v284_v41, %v260_v45  ;;  %v287_v48 = vadd.f32 %v285_v42, %v261_v46  ;;  %v290_v49 = vpop.permute.xlu0 %289 }
  0x9b   : > { %v310_v50 = vmul.f32 %v305_v43, %v290_v49  ;;  %v311_v51 = vmul.f32 %v309_v44, %v290_v49 }
  0x9d   : > { %v312_v52 = vadd.f32 %v310_v50, %v286_v47  ;;  %v313_v53 = vadd.f32 %v311_v51, %v287_v48 }
  0x9f   : > { %314 = vst [vmem:[%s188_s11] sm:$0xff] %v312_v52  ;;  %315 = vst [vmem:[%s188_s11 + $0x8] sm:$0xff] %v313_v53 }
  0xa0   : > { %500 = shalt.err (!%p497_p5)
}
  0xa1   : > { %s501_s30 = scalar_lea.hbm %s663_s23, 256  ;;  %s505_s6 = scalar_lea.hbm %s708_s3, 512 }
  0xa2   : > { %p502_p6 = scmp.ne.s32.totalorder %s663_s23, %s501_s30  ;;  %p506_p10 = scmp.lt.s32.totalorder %s663_s23, %s708_s3 }
  0xa3   : > { %p507_p11 = scmp.lt.s32.totalorder %s505_s6, %s501_s30 }
  0xa4   : > { %p503_p7 = pnand %p502_p6, %p630_p4 }
  0xa5   : > { %p508_p12 = por %p507_p11, %p506_p10 }
  0xa6   : > { %p504_p9 = pneg %p503_p7 }
  0xa8   : > { %p509_p13 = pnand %p508_p12, %p504_p9 }
  0xaa   : > { %512 = shalt.err (!%p509_p13)
}
  0xab   : > { %424 = dma.vmem_to_hbm [thread:$0]  (%p630_p4), %s334_s18, 256, %s663_s23, %s317_s26  }
  0xac PF: > { %p430_p0 = scmp.ge.s32.totalorder %s563_s17, 2  ;;  %s345_s9 = sand.u32 1, %s543_s12  }
  0xad   : > { %s346_s10 = scalar_lea.sflag [#allocation3], %s345_s9 }
  0xae   : > { %p427_p1 = pnand %p430_p0, %p637_p8 }
  0xb0   : > { %p428_p2 = pneg %p427_p1 }
  0xb2   : > { %538 = dma.done.wait (%p428_p2), %s346_s10, 256  }
  0xb3   : > { %540 = vsyncadd (%p428_p2), %s346_s10, 4294967040  ;;  %s16_s17 = sadd.s32 1, %s563_s17   ;;  %s711_s12 = smov %s547_s13 }
  0xb4   : > { %p13_p3 = scmp.ge.s32.totalorder %s16_s17, 4   ;;  %s712_s13 = smov %s551_s14 }
  0xb5   : > { %s713_s14 = smov %s643_s25  ;;  %s714_s15 = smov %s559_s16 }
  0xb6   : > { %s715_s16 = smov %s717_s20  ;;  %15 = sbr.rel (!%p13_p3) target bundleno = 4 (0x4), region = 67 }
  0xbb   :  { %351 = vsyncpa [#allocation3], 1 }
  0xbc   :  { %353 = vsyncpa [#allocation3 + $0x1], 1 }

</bundles_post_ra>
